<compile_context>
chip_gen: v7x
topology: tpu7x:2x2x1
jax: 0.10.0
libtpu: 0.0.40
codegen_flags: <defaults>
</compile_context>

<pallas_src>
import functools

import jax
import jax.numpy as jnp
from jax.experimental import pallas as pl
from jax.experimental.pallas import tpu as pltpu

H = 128  # padded (lane-dense) feature width for every layer


def _round_up(n, m):
    return ((n + m - 1) // m) * m


def _cdiv(a, b):
    return -(-a // b)


def _tpu_tuning():
    """Heuristic (num_tensorcores, max_rows_per_tile) per TPU generation."""
    try:
        kind = jax.devices()[0].device_kind.lower()
    except Exception:
        kind = ""
    if "v7" in kind:
        return 2, 512       # 2 TCs/chip: prefer >=2 batch tiles so both cores run
    if "v5" in kind:
        return 1, 1024      # v5e: smaller tiles (1 vst slot, f32 spill pressure)
    return 1, 2048          # v6e & default: one big tile reaches HBM roofline


def _mlp_kernel(x_ref, w_ref, b_ref, o_ref, xpad_ref, *, in_size):
    # x_ref: (tb, in_size) f32   w_ref: (3, H, H) bf16   b_ref: (3, H) f32
    # o_ref: (tb, H) f32         xpad_ref: (tb, H) f32 VMEM scratch
    #
    # Zero-extend x to lane-dense width inside the kernel (no HBM roundtrip).
    xpad_ref[...] = jnp.zeros_like(xpad_ref)
    xpad_ref[:, :in_size] = x_ref[...]
    x = xpad_ref[...].astype(jnp.bfloat16)

    # fc1 + ReLU (bf16 operands, f32 MXU accumulation)
    h = jnp.dot(x, w_ref[0], preferred_element_type=jnp.float32) + b_ref[0:1, :]
    h = jnp.maximum(h, 0.0)
    # fc2 + ReLU (padded cols are exactly 0: zero weights, zero bias, ReLU(0)=0)
    h = jnp.dot(h.astype(jnp.bfloat16), w_ref[1],
                preferred_element_type=jnp.float32) + b_ref[1:2, :]
    h = jnp.maximum(h, 0.0)
    # fc3 (Q-values, no activation), lane-dense 128-wide store
    out = jnp.dot(h.astype(jnp.bfloat16), w_ref[2],
                  preferred_element_type=jnp.float32) + b_ref[2:3, :]
    o_ref[...] = out.astype(o_ref.dtype)


def pack_params(params, input_size, output_size):
    """Pack real-sized params into zero-padded, lane-dense buffers.

    Returns:
      w_all: (3, 128, 128) bfloat16 -- layer weights, (in, out) layout, zero padded.
      b_all: (3, 128)      float32  -- layer biases, zero padded.
    """
    shapes = [(input_size, 128), (128, 64), (64, output_size)]
    ws, bs = [], []
    for i, (fan_in, fan_out) in enumerate(shapes, start=1):
        w = jnp.zeros((H, H), jnp.float32).at[:fan_in, :fan_out].set(params[f"w{i}"])
        b = jnp.zeros((H,), jnp.float32).at[:fan_out].set(params[f"b{i}"])
        ws.append(w)
        bs.append(b)
    return jnp.stack(ws).astype(jnp.bfloat16), jnp.stack(bs)


def dq_network_forward(x, w_all, b_all, output_size, force_tiles=None):
    """DQNetwork forward pass via one Pallas TPU kernel.

    x: (batch, input_size) float32 (input_size <= 128)
    w_all, b_all: packed/padded params from pack_params.
    Returns (batch, output_size) float32.
    """
    batch, in_size = x.shape
    num_tc, tb_max = _tpu_tuning()

    # Tile selection: >=2 tiles on 2-TC chips for batches >=16, otherwise one tile;
    # never round the batch up beyond a single tile's worth of padding.
    min_tiles = force_tiles if force_tiles is not None else (
        2 if (num_tc >= 2 and batch >= 16) else 1)
    n_tiles = max(min_tiles, _cdiv(batch, tb_max))

    if n_tiles == 1:
        tb, bp = batch, batch            # block == full dim: any batch size is legal
    else:
        tb = _round_up(_cdiv(batch, n_tiles), 8)
        bp = tb * n_tiles

    # Only pad rows (cheap: feature width stays in_size); columns padded in-kernel.
    x_in = x if bp == batch else jnp.zeros((bp, in_size), x.dtype).at[:batch].set(x)

    flops = 2 * bp * H * H * 3
    bytes_accessed = (4 * bp * in_size            # x (f32)
                      + 2 * 3 * H * H             # weights (bf16)
                      + 4 * 3 * H                 # biases (f32)
                      + 4 * bp * H)               # output (f32)

    kernel = functools.partial(_mlp_kernel, in_size=in_size)
    out_padded = pl.pallas_call(
        kernel,
        out_shape=jax.ShapeDtypeStruct((bp, H), jnp.float32),
        grid=(n_tiles,),
        in_specs=[
            pl.BlockSpec((tb, in_size), lambda i: (i, 0)),  # batch tiles stream
            pl.BlockSpec((3, H, H), lambda i: (0, 0, 0)),   # weights resident
            pl.BlockSpec((3, H), lambda i: (0, 0)),         # biases resident
        ],
        out_specs=pl.BlockSpec((tb, H), lambda i: (i, 0)),
        scratch_shapes=[pltpu.VMEM((tb, H), jnp.float32)],
        compiler_params=pltpu.CompilerParams(
            dimension_semantics=("parallel",)),
        cost_estimate=pl.CostEstimate(
            flops=flops, transcendentals=0, bytes_accessed=bytes_accessed),
    )(x_in, w_all, b_all)

    return out_padded[:batch, :output_size]


def init_params(key, input_size, output_size):
    """Deterministic init mimicking PyTorch Linear default (uniform +/- 1/sqrt(fan_in)).

    Weights stored as (in_features, out_features) (pre-transposed vs. PyTorch).
    Biases stored as 1-D (out_features,).
    """
    sizes = [(input_size, 128), (128, 64), (64, output_size)]
    params = {}
    for i, (fan_in, fan_out) in enumerate(sizes, start=1):
        key, kw, kb = jax.random.split(key, 3)
        bound = 1.0 / jnp.sqrt(jnp.float32(fan_in))
        params[f"w{i}"] = jax.random.uniform(
            kw, (fan_in, fan_out), jnp.float32, minval=-bound, maxval=bound)
        params[f"b{i}"] = jax.random.uniform(
            kb, (fan_out,), jnp.float32, minval=-bound, maxval=bound)
    return params


def reference_forward(x, params):
    h1 = jnp.maximum(x @ params["w1"] + params["b1"], 0.0)
    h2 = jnp.maximum(h1 @ params["w2"] + params["b2"], 0.0)
    return h2 @ params["w3"] + params["b3"]


if __name__ == "__main__":
    # Snake-game-like sizes: 11 state features, 3 actions, small batch.
    batch, input_size, output_size = 2, 11, 3

    key = jax.random.PRNGKey(0)
    key, kx, kx2 = jax.random.split(key, 3)
    x = jax.random.normal(kx, (batch, input_size), dtype=jnp.float32)
    params = init_params(key, input_size, output_size)
    w_all, b_all = pack_params(params, input_size, output_size)

    # Inference-style call (jitted so the row-pad / output slice fuse with callers).
    fwd = jax.jit(dq_network_forward, static_argnums=(3,))
    out = jax.block_until_ready(fwd(x, w_all, b_all, output_size))

    ref = reference_forward(x, params)
    assert out.shape == (batch, output_size)
    assert out.dtype == jnp.float32
    # bf16 weights => loosened tolerance vs the f32 reference.
    assert jnp.allclose(out, ref, atol=5e-2, rtol=5e-2), "mismatch vs JAX reference"

    # Also exercise the multi-tile / padded-batch path (as used on v7x or big batches).
    xb = jax.random.normal(kx2, (40, input_size), dtype=jnp.float32)
    out2 = jax.block_until_ready(
        dq_network_forward(xb, w_all, b_all, output_size, force_tiles=2))
    ref2 = reference_forward(xb, params)
    assert out2.shape == (40, output_size)
    assert jnp.allclose(out2, ref2, atol=5e-2, rtol=5e-2), "mismatch (multi-tile path)"

    print("KERNEL_OK")
</pallas_src>

<mosaic_0001>
module attributes {stable_mosaic.version = 11 : i64} {
  func.func @_mlp_kernel(%arg0: i32, %arg1: memref<2x11xf32, #tpu.memory_space<vmem>>, %arg2: memref<3x128x128xbf16, #tpu.memory_space<vmem>>, %arg3: memref<3x128xf32, #tpu.memory_space<vmem>>, %arg4: memref<2x128xf32, #tpu.memory_space<vmem>>, %arg5: memref<2x128xf32, #tpu.memory_space<vmem>>) attributes {dimension_semantics = [#tpu.dimension_semantics<parallel>], iteration_bounds = array<i64: 1>, scalar_prefetch = 0 : i64, scratch_operands = 1 : i64, tpu.core_type = #tpu.core_type<tc>, window_params = [{transform_indices = @transform_0, window_bounds = array<i64: 2, 11>}, {pipeline_mode = #tpu.pipeline_mode<synchronous>, transform_indices = @transform_1, window_bounds = array<i64: 3, 128, 128>}, {pipeline_mode = #tpu.pipeline_mode<synchronous>, transform_indices = @transform_2, window_bounds = array<i64: 3, 128>}, {transform_indices = @transform_3, window_bounds = array<i64: 2, 128>}]} {
    %cst = arith.constant 0.000000e+00 : f32
    %0 = vector.broadcast %cst : f32 to vector<2x128xf32>
    %c0 = arith.constant 0 : index
    %c0_0 = arith.constant 0 : index
    %1 = vector.load %arg5[%c0, %c0_0] : memref<2x128xf32, #tpu.memory_space<vmem>>, vector<2x128xf32>
    tpu.vector_store %arg5[%c0, %c0_0], %0 {strides = array<i32>} : memref<2x128xf32, #tpu.memory_space<vmem>>, vector<2x128xf32>,
    %c0_1 = arith.constant 0 : index
    %c0_2 = arith.constant 0 : index
    %2 = vector.load %arg1[%c0_1, %c0_2] : memref<2x11xf32, #tpu.memory_space<vmem>>, vector<2x11xf32>
    %c0_3 = arith.constant 0 : index
    %c0_4 = arith.constant 0 : index
    %3 = vector.load %arg5[%c0_3, %c0_4] : memref<2x128xf32, #tpu.memory_space<vmem>>, vector<2x11xf32>
    tpu.vector_store %arg5[%c0_3, %c0_4], %2 {strides = array<i32>} : memref<2x128xf32, #tpu.memory_space<vmem>>, vector<2x11xf32>,
    %c0_5 = arith.constant 0 : index
    %c0_6 = arith.constant 0 : index
    %4 = vector.load %arg5[%c0_5, %c0_6] : memref<2x128xf32, #tpu.memory_space<vmem>>, vector<2x128xf32>
    %5 = arith.truncf %4 : vector<2x128xf32> to vector<2x128xbf16>
    %c0_7 = arith.constant 0 : index
    %c0_8 = arith.constant 0 : index
    %c0_9 = arith.constant 0 : index
    %6 = vector.load %arg2[%c0_7, %c0_8, %c0_9] : memref<3x128x128xbf16, #tpu.memory_space<vmem>>, vector<1x128x128xbf16>
    %7 = vector.shape_cast %6 : vector<1x128x128xbf16> to vector<128x128xbf16>
    %cst_10 = arith.constant dense<0.000000e+00> : vector<2x128xf32>
    %8 = tpu.matmul %5, %7, %cst_10 {dimension_numbers = #tpu.dot_dimension_numbers<[1], [0], [0], [1], [0, 0, 1, 1], [], []>} : vector<2x128xbf16>, vector<128x128xbf16>, vector<2x128xf32> -> vector<2x128xf32>
    %c0_11 = arith.constant 0 : index
    %c0_12 = arith.constant 0 : index
    %9 = vector.load %arg3[%c0_11, %c0_12] : memref<3x128xf32, #tpu.memory_space<vmem>>, vector<1x128xf32>
    %10 = vector.broadcast %9 : vector<1x128xf32> to vector<2x128xf32>
    %11 = arith.addf %8, %10 : vector<2x128xf32>
    %cst_13 = arith.constant 0.000000e+00 : f32
    %12 = vector.broadcast %cst_13 : f32 to vector<2x128xf32>
    %13 = arith.maximumf %11, %12 : vector<2x128xf32>
    %14 = arith.truncf %13 : vector<2x128xf32> to vector<2x128xbf16>
    %c1 = arith.constant 1 : index
    %c0_14 = arith.constant 0 : index
    %c0_15 = arith.constant 0 : index
    %15 = vector.load %arg2[%c1, %c0_14, %c0_15] : memref<3x128x128xbf16, #tpu.memory_space<vmem>>, vector<1x128x128xbf16>
    %16 = vector.shape_cast %15 : vector<1x128x128xbf16> to vector<128x128xbf16>
    %cst_16 = arith.constant dense<0.000000e+00> : vector<2x128xf32>
    %17 = tpu.matmul %14, %16, %cst_16 {dimension_numbers = #tpu.dot_dimension_numbers<[1], [0], [0], [1], [0, 0, 1, 1], [], []>} : vector<2x128xbf16>, vector<128x128xbf16>, vector<2x128xf32> -> vector<2x128xf32>
    %c1_17 = arith.constant 1 : index
    %c0_18 = arith.constant 0 : index
    %18 = vector.load %arg3[%c1_17, %c0_18] : memref<3x128xf32, #tpu.memory_space<vmem>>, vector<1x128xf32>
    %19 = vector.broadcast %18 : vector<1x128xf32> to vector<2x128xf32>
    %20 = arith.addf %17, %19 : vector<2x128xf32>
    %cst_19 = arith.constant 0.000000e+00 : f32
    %21 = vector.broadcast %cst_19 : f32 to vector<2x128xf32>
    %22 = arith.maximumf %20, %21 : vector<2x128xf32>
    %23 = arith.truncf %22 : vector<2x128xf32> to vector<2x128xbf16>
    %c2 = arith.constant 2 : index
    %c0_20 = arith.constant 0 : index
    %c0_21 = arith.constant 0 : index
    %24 = vector.load %arg2[%c2, %c0_20, %c0_21] : memref<3x128x128xbf16, #tpu.memory_space<vmem>>, vector<1x128x128xbf16>
    %25 = vector.shape_cast %24 : vector<1x128x128xbf16> to vector<128x128xbf16>
    %cst_22 = arith.constant dense<0.000000e+00> : vector<2x128xf32>
    %26 = tpu.matmul %23, %25, %cst_22 {dimension_numbers = #tpu.dot_dimension_numbers<[1], [0], [0], [1], [0, 0, 1, 1], [], []>} : vector<2x128xbf16>, vector<128x128xbf16>, vector<2x128xf32> -> vector<2x128xf32>
    %c2_23 = arith.constant 2 : index
    %c0_24 = arith.constant 0 : index
    %27 = vector.load %arg3[%c2_23, %c0_24] : memref<3x128xf32, #tpu.memory_space<vmem>>, vector<1x128xf32>
    %28 = vector.broadcast %27 : vector<1x128xf32> to vector<2x128xf32>
    %29 = arith.addf %26, %28 : vector<2x128xf32>
    %c0_25 = arith.constant 0 : index
    %c0_26 = arith.constant 0 : index
    %30 = vector.load %arg4[%c0_25, %c0_26] : memref<2x128xf32, #tpu.memory_space<vmem>>, vector<2x128xf32>
    tpu.vector_store %arg4[%c0_25, %c0_26], %29 {strides = array<i32>} : memref<2x128xf32, #tpu.memory_space<vmem>>, vector<2x128xf32>,
    return
  }
  func.func @transform_0(%arg0: i32) -> (i32, i32) {
    %c0_i32 = arith.constant 0 : i32
    %c0_i32_0 = arith.constant 0 : i32
    return %arg0, %c0_i32 : i32, i32
  }
  func.func @transform_1(%arg0: i32) -> (i32, i32, i32) {
    %c0_i32 = arith.constant 0 : i32
    %c0_i32_0 = arith.constant 0 : i32
    %c0_i32_1 = arith.constant 0 : i32
    %c0_i32_2 = arith.constant 0 : i32
    return %c0_i32, %c0_i32_0, %c0_i32_1 : i32, i32, i32
  }
  func.func @transform_2(%arg0: i32) -> (i32, i32) {
    %c0_i32 = arith.constant 0 : i32
    %c0_i32_0 = arith.constant 0 : i32
    %c0_i32_1 = arith.constant 0 : i32
    return %c0_i32, %c0_i32_0 : i32, i32
  }
  func.func @transform_3(%arg0: i32) -> (i32, i32) {
    %c0_i32 = arith.constant 0 : i32
    %c0_i32_0 = arith.constant 0 : i32
    return %arg0, %c0_i32 : i32, i32
  }
}

</mosaic_0001>

<bundles_post_ra>
// kernel: dq_network_forward.1
= control target key start
LH: loop header
LB: loop body
LE: loop exit
PB: predicated region body
PF: predicated region fallthrough
CT: control target
= control target key end

     0   :  { %8 = vsyncpa [#allocation4], 0  ;;  %s725_s0 = inlined_call_operand.hbm [shape: f32[2,11], index: 0, kind: input, shape index: {}]   ;;  %s726_s1 = inlined_call_operand.hbm [shape: bf16[3,128,128], index: 1, kind: input, shape index: {}]   ;;  %s727_s2 = inlined_call_operand.vmem [shape: f32[3,128], index: 2, kind: input, shape index: {}]   ;;  %s728_s3 = inlined_call_operand.hbm [shape: f32[2,128], index: 3, kind: output, shape index: {}]  }
   0x1   :  { %9 = vsyncpa [#allocation7], 0 }
   0x2   :  { %10 = vsyncpa [#allocation5], 0  ;;  %s615_s12 = smov [#allocation3]   ;;  %s616_s14 = smov [#allocation6]  }
   0x3   :  { %s17_s13 = sshll.u32 %s615_s12, 4  ;;  %s26_s15 = sshll.u32 %s616_s14, 4  ;;  %s18_s13 = int_to_ptr.vmem [resolvable:$true] %s17_s13  ;;  %s642_s15 = int_to_ptr.vmem [resolvable:$true] %s26_s15 }
   0x4   :  { %s543_s18 = scalar_lea.hbm %s725_s0, 32 }
   0x5   :  { %p544_p0 = scmp.ne.s32.totalorder %s725_s0, %s543_s18  ;;  %p547_p1 = scmp.lt.u32.totalorder %s543_s18, %s725_s0 }
   0x7   :  { %p549_p2 = pnand %p547_p1, %p544_p0 }
   0x9   :  { %552 = shalt.err (!%p549_p2)
}
   0xa   :  { %s553_s23 = scalar_lea.vmem %s18_s13, 32  ;;  %p558_p4 = scmp.lt.s32.totalorder %s18_s13, %s18_s13 }
   0xb   :  { %p554_p3 = scmp.ne.s32.totalorder %s18_s13, %s553_s23  ;;  %p559_p5 = scmp.lt.s32.totalorder %s553_s23, %s553_s23 }
   0xd   :  { %p560_p6 = por %p559_p5, %p558_p4 }
   0xf   :  { %p561_p7 = pnand %p560_p6, %p554_p3 }
  0x11   :  { %564 = shalt.err (!%p561_p7)
}
  0x12   :  { %20 = dma.hbm_to_vmem [thread:$0]  %s725_s0, 32, %s18_s13, [#allocation4]  }
  0x13   :  { %s565_s28 = scalar_lea.hbm %s726_s1, 3072 }
  0x14   :  { %p566_p8 = scmp.ne.s32.totalorder %s726_s1, %s565_s28  ;;  %p569_p9 = scmp.lt.u32.totalorder %s565_s28, %s726_s1 }
  0x16   :  { %p571_p10 = pnand %p569_p9, %p566_p8 }
  0x18   :  { %574 = shalt.err (!%p571_p10)
}
  0x19   :  { %s575_s6 = scalar_lea.vmem %s642_s15, 3072  ;;  %p580_p12 = scmp.lt.s32.totalorder %s642_s15, %s642_s15 }
  0x1a   :  { %p576_p11 = scmp.ne.s32.totalorder %s642_s15, %s575_s6  ;;  %p581_p13 = scmp.lt.s32.totalorder %s575_s6, %s575_s6 }
  0x1c   :  { %p582_p0 = por %p581_p13, %p580_p12 }
  0x1e   :  { %p583_p1 = pnand %p582_p0, %p576_p11 }
  0x20   :  { %586 = shalt.err (!%p583_p1)
}
  0x21   :  { %s617_s0 = smov 64   ;;  %s618_s7 = smov 4  }
  0x22   :  { %32 = dma.hbm_to_vmem [thread:$0]  %s726_s1, 3072, %s642_s15, [#allocation7], %s617_s0, %s617_s0, %s618_s7  }
  0x23   :  { %609 = dma.done.wait [#allocation4], 32  }
  0x24   :  { %610 = vsyncadd [#allocation4], 4294967264 }
  0x25   :  { %611 = dma.done.wait [#allocation7], 3072  }
  0x26   :  { %612 = vsyncadd [#allocation7], 4294964224  ;;  %v619_v0 = vmov 0.0   ;;  %vm620_vm0 = vmmov 0   ;;  %v519_v1 = vld [vmem:[#allocation6] sm:$0xff]   ;;  %v520_v2 = vld [vmem:[#allocation6 + $0x8] sm:$0xff]  }
  0x27   :  { %452 = vmatprep.subr.bf16.mxu0 %v619_v0  ;;  %42 = vst [vmem:[#allocation2] sm:$0x3] %v619_v0  ;;  %468 = vmatprep.mubr.msk.bf16.mxu0 %vm620_vm0, %v619_v0  ;;  %v521_v3 = vld [vmem:[#allocation6 + $0x10] sm:$0xff]   ;;  %vm44_vm1 = vcmask 82944   ;;  %v43_v4 = vld [vmem:[#allocation3] sm:$0x3] }
  0x28   :  { %472 = vmatprep.subr.bf16.mxu1 %v619_v0  ;;  %488 = vmatprep.mubr.msk.bf16.mxu1 %vm620_vm0, %v619_v0  ;;  %45 = vst.msk [vmem:[#allocation2] sm:$0x3] %vm44_vm1, %v43_v4  ;;  %v527_v5 = vld [vmem:[#allocation6 + $0x40] sm:$0xff]   ;;  %v522_v6 = vld [vmem:[#allocation6 + $0x18] sm:$0xff]   ;;  %v528_v7 = vld [vmem:[#allocation6 + $0x48] sm:$0xff]   ;;  %s621_s15 = smov [#allocation8]  }
  0x29   :  { %453 = vmatpush3.bf16.msra.mxu0 %v519_v1  ;;  %473 = vmatpush3.bf16.msra.mxu1 %v527_v5  ;;  %v523_v8 = vld [vmem:[#allocation6 + $0x20] sm:$0xff]   ;;  %v529_v9 = vld [vmem:[#allocation6 + $0x50] sm:$0xff]   ;;  %v524_v10 = vld [vmem:[#allocation6 + $0x28] sm:$0xff]   ;;  %s388_s16 = sshll.u32 %s621_s15, 4  ;;  %s389_s16 = int_to_ptr.vmem [resolvable:$true] %s388_s16 }
  0x2a   :  { %454 = vmatprep.subr.bf16.mxu0 %v619_v0  ;;  %474 = vmatprep.subr.bf16.mxu1 %v619_v0  ;;  %v530_v11 = vld [vmem:[#allocation6 + $0x58] sm:$0xff]   ;;  %v525_v12 = vld [vmem:[#allocation6 + $0x30] sm:$0xff]   ;;  %v531_v13 = vld [vmem:[#allocation6 + $0x60] sm:$0xff]   ;;  %s587_s17 = scalar_lea.vmem %s389_s16, 32  ;;  %p592_p3 = scmp.lt.s32.totalorder %s389_s16, %s389_s16 }
  0x2b   :  { %v526_v14 = vld [vmem:[#allocation6 + $0x38] sm:$0xff]   ;;  %v532_v16 = vld [vmem:[#allocation6 + $0x68] sm:$0xff]   ;;  %v533_v18 = vld [vmem:[#allocation6 + $0x70] sm:$0xff]   ;;  %p588_p2 = scmp.ne.s32.totalorder %s389_s16, %s587_s17  ;;  %p593_p4 = scmp.lt.s32.totalorder %s587_s17, %s587_s17 }
  0x2c   :  { %v534_v19 = vld [vmem:[#allocation6 + $0x78] sm:$0xff]   ;;  %v535_v20 = vld [vmem:[#allocation6 + $0x80] sm:$0xff]   ;;  %v536_v21 = vld [vmem:[#allocation6 + $0x88] sm:$0xff]  }
  0x2d   :  { %455 = vmatpush3.bf16.msra.mxu0 %v520_v2  ;;  %475 = vmatpush3.bf16.msra.mxu1 %v528_v7  ;;  %v537_v22 = vld [vmem:[#allocation6 + $0x90] sm:$0xff]   ;;  %v538_v23 = vld [vmem:[#allocation6 + $0x98] sm:$0xff]   ;;  %v539_v24 = vld [vmem:[#allocation6 + $0xa0] sm:$0xff]   ;;  %p594_p5 = por %p593_p4, %p592_p3 }
  0x2e   :  { %456 = vmatprep.subr.bf16.mxu0 %v619_v0  ;;  %476 = vmatprep.subr.bf16.mxu1 %v619_v0  ;;  %v540_v25 = vld [vmem:[#allocation6 + $0xa8] sm:$0xff]   ;;  %v398_v26 = vld [vmem:[%s727_s2] ss:$0 sm:$0xff]  ;;  %v542_v35 = vld [vmem:[#allocation6 + $0xb8] sm:$0xff]  }
  0x2f   :  { %v46_v15 = vld [vmem:[#allocation2] sm:$0x3]  ;;  %v541_v34 = vld [vmem:[#allocation6 + $0xb0] sm:$0xff]   ;;  %p595_p6 = pnand %p594_p5, %p588_p2 }
  0x30   :  { %v47_v17 = vpack.c.bf16 %v46_v15, %v46_v15  ;;  %v407_v36 = vld [vmem:[%s727_s2 + $0x1] ss:$0 sm:$0xff]  ;;  %v416_v44 = vld [vmem:[%s727_s2 + $0x2] ss:$0 sm:$0xff] }
  0x31   :  { %457 = vmatpush3.bf16.msra.mxu0 %v521_v3  ;;  %477 = vmatpush3.bf16.msra.mxu1 %v529_v9 }
  0x32   :  { %458 = vmatprep.subr.bf16.mxu0 %v619_v0  ;;  %478 = vmatprep.subr.bf16.mxu1 %v619_v0 }
  0x35   :  { %459 = vmatpush3.bf16.msra.mxu0 %v522_v6  ;;  %479 = vmatpush3.bf16.msra.mxu1 %v530_v11 }
  0x36   :  { %460 = vmatprep.subr.bf16.mxu0 %v619_v0  ;;  %480 = vmatprep.subr.bf16.mxu1 %v619_v0 }
  0x39   :  { %461 = vmatpush3.bf16.msra.mxu0 %v523_v8  ;;  %481 = vmatpush3.bf16.msra.mxu1 %v531_v13 }
  0x3a   :  { %462 = vmatprep.subr.bf16.mxu0 %v619_v0  ;;  %482 = vmatprep.subr.bf16.mxu1 %v619_v0 }
  0x3d   :  { %463 = vmatpush3.bf16.msra.mxu0 %v524_v10  ;;  %483 = vmatpush3.bf16.msra.mxu1 %v532_v16 }
  0x3e   :  { %464 = vmatprep.subr.bf16.mxu0 %v619_v0  ;;  %484 = vmatprep.subr.bf16.mxu1 %v619_v0 }
  0x41   :  { %465 = vmatpush3.bf16.msra.mxu0 %v525_v12  ;;  %485 = vmatpush3.bf16.msra.mxu1 %v533_v18 }
  0x42   :  { %466 = vmatprep.subr.bf16.mxu0 %v619_v0  ;;  %486 = vmatprep.subr.bf16.mxu1 %v619_v0 }
  0x45   :  { %467 = vmatpush3.bf16.msra.mxu0 %v526_v14  ;;  %487 = vmatpush3.bf16.msra.mxu1 %v534_v19 }
  0x46   :  { %492 = vmatprep.subr.bf16.mxu0 %v619_v0 }
  0x48   :  { %469 = vmatmul.mubr.bf16.vlgmr.msra.gmra.mrb[0].mxu0 %v47_v17 }
  0x49   :  { %508 = vmatprep.mubr.msk.bf16.mxu0 %vm620_vm0, %v619_v0  ;;  %493 = vmatpush3.bf16.msra.mxu0 %v535_v20 }
  0x4a   :  { %494 = vmatprep.subr.bf16.mxu0 %v619_v0 }
  0x4d   :  { %495 = vmatpush3.bf16.msra.mxu0 %v536_v21 }
  0x4e   :  { %496 = vmatprep.subr.bf16.mxu0 %v619_v0 }
  0x51   :  { %497 = vmatpush3.bf16.msra.mxu0 %v537_v22 }
  0x52   :  { %498 = vmatprep.subr.bf16.mxu0 %v619_v0 }
  0x55   :  { %499 = vmatpush3.bf16.msra.mxu0 %v538_v23 }
  0x56   :  { %500 = vmatprep.subr.bf16.mxu0 %v619_v0 }
  0x59   :  { %501 = vmatpush3.bf16.msra.mxu0 %v539_v24 }
  0x5a   :  { %502 = vmatprep.subr.bf16.mxu0 %v619_v0 }
  0x5d   :  { %503 = vmatpush3.bf16.msra.mxu0 %v540_v25 }
  0x5e   :  { %504 = vmatprep.subr.bf16.mxu0 %v619_v0 }
  0x61   :  { %505 = vmatpush3.bf16.msra.mxu0 %v541_v34 }
  0x62   :  { %506 = vmatprep.subr.bf16.mxu0 %v619_v0 }
  0x65   :  { %507 = vmatpush3.bf16.msra.mxu0 %v542_v35 }
 0x11b   :  { %v151_v27 = vpop.f32.mrb[0].mxu0 }
 0x11c   :  { %v152_v28 = vadd.f32 %v398_v26, %v151_v27  ;;  %v470_v29 = vpop.f32.mrb[1].mxu0 }
 0x11d   :  { %v154_v30 = vpop.f32.mrb[2].mxu0 }
 0x11e   :  { %v157_v31 = vmax.f32 %v152_v28, 0.0  ;;  %v471_v32 = vpop.f32.mrb[3].mxu0 }
 0x120   :  { %v158_v33 = vpack.c.bf16 %v157_v31, %v157_v31 }
 0x122   :  { %489 = vmatmul.mubr.bf16.vlgmr.msra.gmra.mrb[0].mxu1 %v158_v33 }
 0x1f5   :  { %v263_v37 = vpop.f32.mrb[0].mxu1 }
 0x1f6   :  { %v264_v38 = vadd.f32 %v407_v36, %v263_v37  ;;  %v490_v39 = vpop.f32.mrb[1].mxu1 }
 0x1f7   :  { %v266_v40 = vpop.f32.mrb[2].mxu1 }
 0x1f8   :  { %v269_v41 = vmax.f32 %v264_v38, 0.0  ;;  %v491_v42 = vpop.f32.mrb[3].mxu1 }
 0x1fa   :  { %v270_v43 = vpack.c.bf16 %v269_v41, %v269_v41 }
 0x1fc   :  { %509 = vmatmul.mubr.bf16.vlgmr.msra.gmra.mrb[4].mxu0 %v270_v43 }
 0x2cf   :  { %v375_v45 = vpop.f32.mrb[4].mxu0 }
 0x2d0   :  { %v376_v46 = vadd.f32 %v416_v44, %v375_v45  ;;  %v510_v47 = vpop.f32.mrb[5].mxu0 }
 0x2d1   :  { %v378_v48 = vpop.f32.mrb[6].mxu0 }
 0x2d2   :  { %381 = vst [vmem:[#allocation8] sm:$0x3] %v376_v46  ;;  %v511_v49 = vpop.f32.mrb[7].mxu0 }
 0x2d3   :  { %598 = shalt.err (!%p595_p6)
}
 0x2d4   :  { %s599_s2 = scalar_lea.hbm %s728_s3, 32 }
 0x2d5   :  { %p600_p7 = scmp.ne.s32.totalorder %s728_s3, %s599_s2  ;;  %p603_p8 = scmp.lt.u32.totalorder %s599_s2, %s728_s3 }
 0x2d7   :  { %p605_p9 = pnand %p603_p8, %p600_p7 }
 0x2d9   :  { %608 = shalt.err (!%p605_p9)
}
 0x2da   :  { %391 = dma.vmem_to_hbm [thread:$0]  %s389_s16, 32, %s728_s3, [#allocation5]  }
 0x2db   :  { %613 = dma.done.wait [#allocation5], 32  }
 0x2dc   :  { %614 = vsyncadd [#allocation5], 4294967264 }
 0x2dd   :  { %395 = vsyncpa [#allocation4], 1 }
 0x2de   :  { %396 = vsyncpa [#allocation7], 1 }
 0x2df   :  { %397 = vsyncpa [#allocation5], 1 }

</bundles_post_ra>
